<compile_context>
chip_gen: v5e
topology: v5e:2x2
jax: 0.10.0
libtpu: 0.0.40
codegen_flags: <defaults>
</compile_context>

<pallas_src>
import jax
import jax.numpy as jnp
from jax import lax
from jax.experimental import pallas as pl
from jax.experimental.pallas import tpu as pltpu

FILTER_SIZES = (3, 4, 5)        # matches PyTorch default filter_sizes=[3, 4, 5]
NUM_FILTERS = (8, 8, 8)         # small, same structure as [100, 100, 100]
NUM_CLASSES = 2
MAX_FS = max(FILTER_SIZES)
C_TOTAL = sum(NUM_FILTERS)


def cnn_nlp_kernel(x_ref, wconv_ref, bconv_ref, wfc_ref, bfc_ref, out_ref):
    x = x_ref[...]                                     # (B, L) f32
    B, L = x.shape

    # Start the logits accumulator with the fc bias (broadcasts (1,NC)->(B,NC)).
    logits = bfc_ref[...]

    col = 0
    for i, fs in enumerate(FILTER_SIZES):
        C = NUM_FILTERS[i]
        Lout = L - fs + 1                              # per-filter-size Lout

        # im2col: stack the fs shifted time windows along a new (small) axis.
        # unf[b, k, t] = x[b, t + k]   -> (B, fs, Lout)
        unf = jnp.stack([x[:, k:k + Lout] for k in range(fs)], axis=1)

        # Conv taps contracted on the MXU as a batched matmul:
        #   (B, fs, Lout) x (B, fs, C) -> (B, Lout, C)
        w = wconv_ref[0:fs, col:col + C]               # (fs, C), static slice
        w_b = jnp.broadcast_to(w[None, :, :], (B, fs, C))
        conv = jnp.einsum('bfl,bfc->blc', unf, w_b,
                          preferred_element_type=jnp.float32)

        # Global max-pool over time FIRST, then bias + ReLU on the tiny (B, C)
        # result (equivalent to PyTorch's relu-then-maxpool).
        pooled = jnp.max(conv, axis=1)                 # (B, C)
        feat = jnp.maximum(pooled + bconv_ref[:, col:col + C], 0.0)

        # FC contribution of this branch: feat @ wfc[:, col:col+C].T  (MXU).
        # Summing the three partial dots replaces the lane concat.
        logits = logits + lax.dot_general(
            feat, wfc_ref[:, col:col + C],
            dimension_numbers=(((1,), (1,)), ((), ())),
            preferred_element_type=jnp.float32)
        col += C

    # TODO(synk): out last-dim = NUM_CLASSES = 2 forces masked stores; for
    # production batch sizes store logits transposed (classes, B) or pad lanes.
    out_ref[...] = logits


def cnn_nlp_forward(x_bl, params):
    """x_bl: (B, L) float32 (channel-squeezed NCL input)."""
    B = x_bl.shape[0]
    vmem = lambda: pl.BlockSpec(memory_space=pltpu.MemorySpace.VMEM)
    # TODO(synk): at production scale (num_filters=100, large B*L) add a batch
    # grid with dimension_semantics=("parallel",) and re-derive the tile size
    # for v7x's 64 MiB VMEM; gridless is optimal at these toy shapes.
    return pl.pallas_call(
        cnn_nlp_kernel,
        out_shape=jax.ShapeDtypeStruct((B, NUM_CLASSES), jnp.float32),
        in_specs=[vmem() for _ in range(5)],
        out_specs=vmem(),
    )(x_bl, params["wconv"], params["bconv"], params["wfc"], params["bfc"])


def pack_params(conv_ws, conv_bs, wfc, bfc):
    """Pack PyTorch-layout params into the kernel's fused operands."""
    wconv = jnp.zeros((MAX_FS, C_TOTAL), jnp.float32)
    bconv = jnp.zeros((1, C_TOTAL), jnp.float32)
    col = 0
    for i, fs in enumerate(FILTER_SIZES):
        C = NUM_FILTERS[i]
        w_t = jnp.transpose(conv_ws[i][:, 0, :], (1, 0))        # (fs, C)
        wconv = wconv.at[0:fs, col:col + C].set(w_t)
        bconv = bconv.at[:, col:col + C].set(conv_bs[i].reshape(1, C))
        col += C
    return {"wconv": wconv, "bconv": bconv,
            "wfc": wfc, "bfc": bfc.reshape(1, NUM_CLASSES)}


def ref_forward(x_ncl, conv_ws, conv_bs, wfc, bfc):
    """Pure-JAX reference mirroring the PyTorch forward semantics."""
    x = x_ncl[:, 0, :]                                 # (B, L)
    feats = []
    for i, fs in enumerate(FILTER_SIZES):
        w_t = jnp.transpose(conv_ws[i][:, 0, :], (1, 0))        # (fs, C)
        Lout = x.shape[1] - fs + 1
        unf = jnp.stack([x[:, k:k + Lout] for k in range(fs)], axis=-1)  # (B,Lout,fs)
        conv = unf @ w_t + conv_bs[i][None, None, :]
        conv = jnp.maximum(conv, 0.0)                  # ReLU then max-pool
        feats.append(jnp.max(conv, axis=1))
    cat = jnp.concatenate(feats, axis=1)
    # TODO(synk): nn.Dropout(p=0.5) is identity at inference time; omitted.
    return cat @ wfc.T + bfc[None, :]


if __name__ == "__main__":
    key = jax.random.PRNGKey(0)
    keys = jax.random.split(key, 10)

    B, L = 2, 16
    # PyTorch forward expects NCL with a single channel: (B, 1, L)
    x = jax.random.normal(keys[0], (B, 1, L), jnp.float32)

    conv_ws, conv_bs = [], []
    for i, fs in enumerate(FILTER_SIZES):
        C = NUM_FILTERS[i]
        # PyTorch Conv1d weight shape: (out_channels, in_channels=1, kernel_size)
        conv_ws.append(jax.random.normal(keys[1 + 2 * i], (C, 1, fs), jnp.float32) * 0.1)
        conv_bs.append(jax.random.normal(keys[2 + 2 * i], (C,), jnp.float32) * 0.1)

    # PyTorch nn.Linear: weight (num_classes, sum(num_filters)), bias (num_classes,)
    wfc = jax.random.normal(keys[7], (NUM_CLASSES, C_TOTAL), jnp.float32) * 0.1
    bfc = jax.random.normal(keys[8], (NUM_CLASSES,), jnp.float32) * 0.1

    params = pack_params(conv_ws, conv_bs, wfc, bfc)

    logits = cnn_nlp_forward(x[:, 0, :], params)
    jax.block_until_ready(logits)

    expected = ref_forward(x, conv_ws, conv_bs, wfc, bfc)
    assert logits.shape == (B, NUM_CLASSES)
    assert jnp.allclose(logits, expected, atol=1e-5, rtol=1e-5)

    print("KERNEL_OK")
</pallas_src>

<mosaic_0001>
module attributes {stable_mosaic.version = 11 : i64} {
  func.func @cnn_nlp_kernel(%arg0: memref<2x16xf32, #tpu.memory_space<vmem>>, %arg1: memref<5x24xf32, #tpu.memory_space<vmem>>, %arg2: memref<1x24xf32, #tpu.memory_space<vmem>>, %arg3: memref<2x24xf32, #tpu.memory_space<vmem>>, %arg4: memref<1x2xf32, #tpu.memory_space<vmem>>, %arg5: memref<2x2xf32, #tpu.memory_space<vmem>>) attributes {dimension_semantics = [], scalar_prefetch = 0 : i64, scratch_operands = 0 : i64, tpu.core_type = #tpu.core_type<tc>} {
    %c0 = arith.constant 0 : index
    %c0_0 = arith.constant 0 : index
    %0 = vector.load %arg0[%c0, %c0_0] : memref<2x16xf32, #tpu.memory_space<vmem>>, vector<2x16xf32>
    %c0_1 = arith.constant 0 : index
    %c0_2 = arith.constant 0 : index
    %1 = vector.load %arg4[%c0_1, %c0_2] : memref<1x2xf32, #tpu.memory_space<vmem>>, vector<1x2xf32>
    %2 = vector.extract_strided_slice %0 {offsets = [0, 0], sizes = [2, 14], strides = [1, 1]} : vector<2x16xf32> to vector<2x14xf32>
    %3 = vector.extract_strided_slice %0 {offsets = [0, 1], sizes = [2, 14], strides = [1, 1]} : vector<2x16xf32> to vector<2x14xf32>
    %4 = vector.extract_strided_slice %0 {offsets = [0, 2], sizes = [2, 14], strides = [1, 1]} : vector<2x16xf32> to vector<2x14xf32>
    %5 = vector.shape_cast %2 : vector<2x14xf32> to vector<2x1x14xf32>
    %6 = vector.shape_cast %3 : vector<2x14xf32> to vector<2x1x14xf32>
    %7 = vector.shape_cast %4 : vector<2x14xf32> to vector<2x1x14xf32>
    %8 = tpu.concatenate %5, %6, %7 in 1 : vector<2x1x14xf32>, vector<2x1x14xf32>, vector<2x1x14xf32> -> vector<2x3x14xf32>
    %c0_3 = arith.constant 0 : index
    %c0_4 = arith.constant 0 : index
    %9 = vector.load %arg1[%c0_3, %c0_4] : memref<5x24xf32, #tpu.memory_space<vmem>>, vector<3x8xf32>
    %10 = vector.shape_cast %9 : vector<3x8xf32> to vector<1x3x8xf32>
    %11 = vector.shape_cast %10 : vector<1x3x8xf32> to vector<1x3x8xf32>
    %12 = vector.broadcast %11 : vector<1x3x8xf32> to vector<2x3x8xf32>
    "tpu.trace_start"() <{level = 10 : i32, message = "bfl,bfc->blc"}> : () -> ()
    %cst = arith.constant dense<0.000000e+00> : vector<2x14x8xf32>
    %13 = tpu.matmul %8, %12, %cst {dimension_numbers = #tpu.dot_dimension_numbers<[1], [1], [2], [2], [0, 0, 0, 2, 1, 2], [0], [0]>} : vector<2x3x14xf32>, vector<2x3x8xf32>, vector<2x14x8xf32> -> vector<2x14x8xf32>
    "tpu.trace_stop"() : () -> ()
    %cst_5 = arith.constant dense<0xFF800000> : vector<2x8xf32>
    %14 = vector.multi_reduction <maximumf>, %13, %cst_5 [1] : vector<2x14x8xf32> to vector<2x8xf32>
    %c0_6 = arith.constant 0 : index
    %c0_7 = arith.constant 0 : index
    %15 = vector.load %arg2[%c0_6, %c0_7] : memref<1x24xf32, #tpu.memory_space<vmem>>, vector<1x8xf32>
    %16 = vector.broadcast %15 : vector<1x8xf32> to vector<2x8xf32>
    %17 = arith.addf %14, %16 : vector<2x8xf32>
    %cst_8 = arith.constant 0.000000e+00 : f32
    %18 = vector.broadcast %cst_8 : f32 to vector<2x8xf32>
    %19 = arith.maximumf %17, %18 : vector<2x8xf32>
    %c0_9 = arith.constant 0 : index
    %c0_10 = arith.constant 0 : index
    %20 = vector.load %arg3[%c0_9, %c0_10] : memref<2x24xf32, #tpu.memory_space<vmem>>, vector<2x8xf32>
    %cst_11 = arith.constant dense<0.000000e+00> : vector<2x2xf32>
    %21 = tpu.matmul %19, %20, %cst_11 {dimension_numbers = #tpu.dot_dimension_numbers<[1], [1], [0], [0], [0, 0, 1, 0], [], []>} : vector<2x8xf32>, vector<2x8xf32>, vector<2x2xf32> -> vector<2x2xf32>
    %22 = vector.broadcast %1 : vector<1x2xf32> to vector<2x2xf32>
    %23 = arith.addf %22, %21 : vector<2x2xf32>
    %24 = vector.extract_strided_slice %0 {offsets = [0, 0], sizes = [2, 13], strides = [1, 1]} : vector<2x16xf32> to vector<2x13xf32>
    %25 = vector.extract_strided_slice %0 {offsets = [0, 1], sizes = [2, 13], strides = [1, 1]} : vector<2x16xf32> to vector<2x13xf32>
    %26 = vector.extract_strided_slice %0 {offsets = [0, 2], sizes = [2, 13], strides = [1, 1]} : vector<2x16xf32> to vector<2x13xf32>
    %27 = vector.extract_strided_slice %0 {offsets = [0, 3], sizes = [2, 13], strides = [1, 1]} : vector<2x16xf32> to vector<2x13xf32>
    %28 = vector.shape_cast %24 : vector<2x13xf32> to vector<2x1x13xf32>
    %29 = vector.shape_cast %25 : vector<2x13xf32> to vector<2x1x13xf32>
    %30 = vector.shape_cast %26 : vector<2x13xf32> to vector<2x1x13xf32>
    %31 = vector.shape_cast %27 : vector<2x13xf32> to vector<2x1x13xf32>
    %32 = tpu.concatenate %28, %29, %30, %31 in 1 : vector<2x1x13xf32>, vector<2x1x13xf32>, vector<2x1x13xf32>, vector<2x1x13xf32> -> vector<2x4x13xf32>
    %c0_12 = arith.constant 0 : index
    %c8 = arith.constant 8 : index
    %33 = vector.load %arg1[%c0_12, %c8] : memref<5x24xf32, #tpu.memory_space<vmem>>, vector<4x8xf32>
    %34 = vector.shape_cast %33 : vector<4x8xf32> to vector<1x4x8xf32>
    %35 = vector.shape_cast %34 : vector<1x4x8xf32> to vector<1x4x8xf32>
    %36 = vector.broadcast %35 : vector<1x4x8xf32> to vector<2x4x8xf32>
    "tpu.trace_start"() <{level = 10 : i32, message = "bfl,bfc->blc"}> : () -> ()
    %cst_13 = arith.constant dense<0.000000e+00> : vector<2x13x8xf32>
    %37 = tpu.matmul %32, %36, %cst_13 {dimension_numbers = #tpu.dot_dimension_numbers<[1], [1], [2], [2], [0, 0, 0, 2, 1, 2], [0], [0]>} : vector<2x4x13xf32>, vector<2x4x8xf32>, vector<2x13x8xf32> -> vector<2x13x8xf32>
    "tpu.trace_stop"() : () -> ()
    %cst_14 = arith.constant dense<0xFF800000> : vector<2x8xf32>
    %38 = vector.multi_reduction <maximumf>, %37, %cst_14 [1] : vector<2x13x8xf32> to vector<2x8xf32>
    %c0_15 = arith.constant 0 : index
    %c8_16 = arith.constant 8 : index
    %39 = vector.load %arg2[%c0_15, %c8_16] : memref<1x24xf32, #tpu.memory_space<vmem>>, vector<1x8xf32>
    %40 = vector.broadcast %39 : vector<1x8xf32> to vector<2x8xf32>
    %41 = arith.addf %38, %40 : vector<2x8xf32>
    %cst_17 = arith.constant 0.000000e+00 : f32
    %42 = vector.broadcast %cst_17 : f32 to vector<2x8xf32>
    %43 = arith.maximumf %41, %42 : vector<2x8xf32>
    %c0_18 = arith.constant 0 : index
    %c8_19 = arith.constant 8 : index
    %44 = vector.load %arg3[%c0_18, %c8_19] : memref<2x24xf32, #tpu.memory_space<vmem>>, vector<2x8xf32>
    %cst_20 = arith.constant dense<0.000000e+00> : vector<2x2xf32>
    %45 = tpu.matmul %43, %44, %cst_20 {dimension_numbers = #tpu.dot_dimension_numbers<[1], [1], [0], [0], [0, 0, 1, 0], [], []>} : vector<2x8xf32>, vector<2x8xf32>, vector<2x2xf32> -> vector<2x2xf32>
    %46 = arith.addf %23, %45 : vector<2x2xf32>
    %47 = vector.extract_strided_slice %0 {offsets = [0, 0], sizes = [2, 12], strides = [1, 1]} : vector<2x16xf32> to vector<2x12xf32>
    %48 = vector.extract_strided_slice %0 {offsets = [0, 1], sizes = [2, 12], strides = [1, 1]} : vector<2x16xf32> to vector<2x12xf32>
    %49 = vector.extract_strided_slice %0 {offsets = [0, 2], sizes = [2, 12], strides = [1, 1]} : vector<2x16xf32> to vector<2x12xf32>
    %50 = vector.extract_strided_slice %0 {offsets = [0, 3], sizes = [2, 12], strides = [1, 1]} : vector<2x16xf32> to vector<2x12xf32>
    %51 = vector.extract_strided_slice %0 {offsets = [0, 4], sizes = [2, 12], strides = [1, 1]} : vector<2x16xf32> to vector<2x12xf32>
    %52 = vector.shape_cast %47 : vector<2x12xf32> to vector<2x1x12xf32>
    %53 = vector.shape_cast %48 : vector<2x12xf32> to vector<2x1x12xf32>
    %54 = vector.shape_cast %49 : vector<2x12xf32> to vector<2x1x12xf32>
    %55 = vector.shape_cast %50 : vector<2x12xf32> to vector<2x1x12xf32>
    %56 = vector.shape_cast %51 : vector<2x12xf32> to vector<2x1x12xf32>
    %57 = tpu.concatenate %52, %53, %54, %55, %56 in 1 : vector<2x1x12xf32>, vector<2x1x12xf32>, vector<2x1x12xf32>, vector<2x1x12xf32>, vector<2x1x12xf32> -> vector<2x5x12xf32>
    %c0_21 = arith.constant 0 : index
    %c16 = arith.constant 16 : index
    %58 = vector.load %arg1[%c0_21, %c16] : memref<5x24xf32, #tpu.memory_space<vmem>>, vector<5x8xf32>
    %59 = vector.shape_cast %58 : vector<5x8xf32> to vector<1x5x8xf32>
    %60 = vector.shape_cast %59 : vector<1x5x8xf32> to vector<1x5x8xf32>
    %61 = vector.broadcast %60 : vector<1x5x8xf32> to vector<2x5x8xf32>
    "tpu.trace_start"() <{level = 10 : i32, message = "bfl,bfc->blc"}> : () -> ()
    %cst_22 = arith.constant dense<0.000000e+00> : vector<2x12x8xf32>
    %62 = tpu.matmul %57, %61, %cst_22 {dimension_numbers = #tpu.dot_dimension_numbers<[1], [1], [2], [2], [0, 0, 0, 2, 1, 2], [0], [0]>} : vector<2x5x12xf32>, vector<2x5x8xf32>, vector<2x12x8xf32> -> vector<2x12x8xf32>
    "tpu.trace_stop"() : () -> ()
    %cst_23 = arith.constant dense<0xFF800000> : vector<2x8xf32>
    %63 = vector.multi_reduction <maximumf>, %62, %cst_23 [1] : vector<2x12x8xf32> to vector<2x8xf32>
    %c0_24 = arith.constant 0 : index
    %c16_25 = arith.constant 16 : index
    %64 = vector.load %arg2[%c0_24, %c16_25] : memref<1x24xf32, #tpu.memory_space<vmem>>, vector<1x8xf32>
    %65 = vector.broadcast %64 : vector<1x8xf32> to vector<2x8xf32>
    %66 = arith.addf %63, %65 : vector<2x8xf32>
    %cst_26 = arith.constant 0.000000e+00 : f32
    %67 = vector.broadcast %cst_26 : f32 to vector<2x8xf32>
    %68 = arith.maximumf %66, %67 : vector<2x8xf32>
    %c0_27 = arith.constant 0 : index
    %c16_28 = arith.constant 16 : index
    %69 = vector.load %arg3[%c0_27, %c16_28] : memref<2x24xf32, #tpu.memory_space<vmem>>, vector<2x8xf32>
    %cst_29 = arith.constant dense<0.000000e+00> : vector<2x2xf32>
    %70 = tpu.matmul %68, %69, %cst_29 {dimension_numbers = #tpu.dot_dimension_numbers<[1], [1], [0], [0], [0, 0, 1, 0], [], []>} : vector<2x8xf32>, vector<2x8xf32>, vector<2x2xf32> -> vector<2x2xf32>
    %71 = arith.addf %46, %70 : vector<2x2xf32>
    %c0_30 = arith.constant 0 : index
    %c0_31 = arith.constant 0 : index
    %72 = vector.load %arg5[%c0_30, %c0_31] : memref<2x2xf32, #tpu.memory_space<vmem>>, vector<2x2xf32>
    tpu.vector_store %arg5[%c0_30, %c0_31], %71 {strides = array<i32>} : memref<2x2xf32, #tpu.memory_space<vmem>>, vector<2x2xf32>,
    return
  }
}

</mosaic_0001>

<bundles_post_ra>
// kernel: tpu_custom_call.1
= control target key start
LH: loop header
LB: loop body
LE: loop exit
PB: predicated region body
PF: predicated region fallthrough
CT: control target
= control target key end

     0   :  { %10 = vsyncpa [#allocation3], 0  ;;  %s945_s0 = inlined_call_operand.hbm [shape: f32[2,16], index: 0, kind: input, shape index: {}]   ;;  %s946_s1 = inlined_call_operand.hbm [shape: f32[5,24], index: 1, kind: input, shape index: {}]   ;;  %s947_s2 = inlined_call_operand.hbm [shape: f32[1,24], index: 2, kind: input, shape index: {}]   ;;  %s948_s3 = inlined_call_operand.vmem [shape: f32[2,24], index: 3, kind: input, shape index: {}]   ;;  %s949_s4 = inlined_call_operand.vmem [shape: f32[1,2], index: 4, kind: input, shape index: {}]   ;;  %s950_s5 = inlined_call_operand.hbm [shape: f32[2,2], index: 5, kind: output, shape index: {}]  }
   0x1   :  { %11 = vsyncpa [#allocation6], 0  ;;  %s29_s20 = sshll.u32 %s946_s1, 4  ;;  %s30_s20 = int_to_ptr.hbm [resolvable:$true] %s29_s20 }
   0x2   :  { %12 = vsyncpa [#allocation4], 0  ;;  %s839_s21 = smov [#allocation5]   ;;  %s18_s25 = sshll.u32 %s945_s0, 4  ;;  %s19_s25 = int_to_ptr.hbm [resolvable:$true] %s18_s25 }
   0x3   :  { %s31_s22 = sshll.u32 %s839_s21, 4  ;;  %s840_s26 = smov [#allocation2]   ;;  %s32_s22 = int_to_ptr.vmem [resolvable:$true] %s31_s22 }
   0x4   :  { %34 = dma.hbm_to_vmem [thread:$0]  %s30_s20, 128, %s32_s22, [#allocation6]  }
   0x5   :  { %s20_s27 = sshll.u32 %s840_s26, 4  ;;  %s40_s30 = sshll.u32 %s947_s2, 4  ;;  %s21_s27 = int_to_ptr.vmem [resolvable:$true] %s20_s27  ;;  %s41_s30 = int_to_ptr.hbm [resolvable:$true] %s40_s30 }
   0x6   :  { %23 = dma.hbm_to_vmem [thread:$0]  %s19_s25, 32, %s21_s27, [#allocation3]  }
   0x7   :  { %s841_s1 = smov [#allocation7]  }
   0x8   :  { %s42_s6 = sshll.u32 %s841_s1, 4  ;;  %s43_s6 = int_to_ptr.vmem [resolvable:$true] %s42_s6 }
   0x9   :  { %45 = dma.hbm_to_vmem [thread:$0]  %s41_s30, 16, %s43_s6, [#allocation6]  }
   0xa   :  { %833 = dma.done.wait [#allocation3], 32  }
   0xb   :  { %834 = vsyncadd [#allocation3], 4294967264 }
   0xc   :  { %835 = dma.done.wait [#allocation6], 144  }
   0xd   :  { %836 = vsyncadd [#allocation6], 4294967152  ;;  %v62_v0 = vld [vmem:[#allocation2] sm:$0x3]  ;;  %s842_s0 = smov 127   ;;  %s843_s7 = smov 126  }
   0xe   :  { %v67_v1 = vperm.slane %v62_v0, 0  ;;  %v65_v2 = vrot.slane %v62_v0, 1  ;;  %s844_s2 = smov 125   ;;  %v286_v4 = vld [vmem:[#allocation5] sm:$0xf]  ;;  %s845_s8 = smov 124  }
   0xf   :  { %s846_s9 = smov 120   ;;  %v486_v5 = vld [vmem:[#allocation5] sm:$0x1f]  ;;  %s847_s10 = smov 112   ;;  %vm81_vm0 = vcmask 1040384   ;;  %vm84_vm1 = vcmask 1041408  }
  0x10   :  { %69 = vrot.lane.b32.xlu1 %v67_v1, %s842_s0  ;;  %v68_v3 = vperm.slane %v65_v2, 0  ;;  %vm127_vm2 = vcmask 1042432   ;;  %vm329_vm3 = vcmask 1043456   ;;  %v87_v20 = vld [vmem:[#allocation5] sm:$0x7]  ;;  %vm120_vm4 = vcmask 23552  }
  0x11   :  { %701 = vmatpush.msk.msra.mxu1 %vm127_vm2, %v87_v20  ;;  %698 = vmatpush.msk.msra.mxu0 %vm127_vm2, %v87_v20  ;;  %vm215_vm5 = vcmask 64512   ;;  %v243_v25 = vld [vmem:[%s948_s3] sm:$0x3]  ;;  %vm529_vm6 = vcmask 1044480   ;;  %vm217_vm7 = vcmask 62464   ;;  %vm322_vm8 = vcmask 31744  }
  0x12   :  { %71 = vrot.lane.b32.xlu0 %v68_v3, %s842_s0  ;;  %704 = vmatpush.xpose.msk.msra.mxu2 %vm215_vm5, %v243_v25  ;;  %v733_v50 = vld [vmem:[#allocation7] ss:$0 sm:$0xff]  ;;  %vm522_vm9 = vcmask 39936   ;;  %v445_v60 = vld [vmem:[%s948_s3] sm:$0x3]  ;;  %vm247_vm10 = vcmask 1041409  }
  0x13   :  { %v734_v52 = vld [vmem:[#allocation7] ss:$0 sm:$0xff]  ;;  %vm417_vm11 = vcmask 61440   ;;  %vm617_vm12 = vcmask 60416   ;;  %s848_s18 = smov [#allocation8]   ;;  %s687_s22 = sshll.u32 %s950_s5, 4  ;;  %s688_s22 = int_to_ptr.hbm [resolvable:$true] %s687_s22 }
  0x14   :  { %s685_s19 = sshll.u32 %s848_s18, 4  ;;  %vm678_vm13 = vcmask 9216   ;;  %s686_s19 = int_to_ptr.vmem [resolvable:$true] %s685_s19 }
  0x18   :  { %75 = vrot.lane.b32.xlu1 %v67_v1, %s843_s7 }
  0x1a   :  { %77 = vrot.lane.b32.xlu0 %v68_v3, %s843_s7 }
  0x20   :  { %280 = vrot.lane.b32.xlu1 %v68_v3, %s844_s2 }
  0x22   :  { %278 = vrot.lane.b32.xlu0 %v67_v1, %s844_s2 }
  0x28   :  { %480 = vrot.lane.b32.xlu1 %v68_v3, %s845_s8  ;;  %v735_v3 = vld [vmem:[#allocation7] ss:$0 sm:$0xff] }
  0x2a   :  { %320 = vrot.lane.b32.xlu0 %v286_v4, %s846_s9  ;;  %v645_v4 = vld [vmem:[%s948_s3] sm:$0x3] }
  0x32   :  { %520 = vrot.lane.b32.xlu0 %v486_v5, %s847_s10 }
  0x82   :  { %v70_v6 = vpop.permute.xlu1 %69 }
  0x83   :  { %v82_v12 = vsel %vm81_vm0, %v62_v0, %v70_v6 }
  0x84   :  { %v72_v7 = vpop.permute.xlu0 %71 }
  0x85   :  { %v83_v9 = vsel %vm81_vm0, %v65_v2, %v72_v7 }
  0x8a   :  { %v76_v8 = vpop.permute.xlu1 %75 }
  0x8b   :  { %v85_v13 = vsel %vm84_vm1, %v82_v12, %v76_v8 }
  0x8c   :  { %v78_v10 = vpop.permute.xlu0 %77 }
  0x8d   :  { %v86_v11 = vsel %vm84_vm1, %v83_v9, %v78_v10 }
  0x8e   :  { %154 = vxpose.xlu2.b32.start.end [1/1] (short) (narrow) %v86_v11, 16 }
  0x92   :  { %v281_v14 = vpop.permute.xlu1 %280 }
  0x93   :  { %v285_v15 = vsel %vm127_vm2, %v86_v11, %v281_v14 }
  0x94   :  { %355 = vxpose.xlu0.b32.start.end [1/1] (short) (narrow) %v285_v15, 16  ;;  %v279_v16 = vpop.permute.xlu0 %278 }
  0x95   :  { %v284_v17 = vsel %vm127_vm2, %v85_v13, %v279_v16 }
  0x96   :  { %287 = vxpose.xlu1.b32.start.end [1/1] (short) (narrow) %v284_v17, 16 }
  0x9a   :  { %v481_v18 = vpop.permute.xlu1 %480 }
  0x9b   :  { %v485_v19 = vsel %vm329_vm3, %v285_v15, %v481_v18 }
  0x9c   :  { %v321_v26 = vpop.permute.xlu0 %320 }
  0x9d   :  { %706 = vmatpush.msk.msra.mxu3 %vm329_vm3, %v321_v26  ;;  %709 = vmatpush.msk.msrb.mxu2 %vm329_vm3, %v321_v26 }
  0x9e   :  { %88 = vxpose.xlu2.b32.start.end [1/1] (short) (narrow) %v85_v13, 16 }
  0xa4   :  { %555 = vxpose.xlu0.b32.start.end [1/1] (short) (narrow) %v485_v19, 16  ;;  %v521_v27 = vpop.permute.xlu0 %520 }
  0xa5   :  { %714 = vmatpush.msk.msrb.mxu1 %vm529_vm6, %v521_v27  ;;  %717 = vmatpush.msk.msrb.mxu3 %vm529_vm6, %v521_v27 }
 0x10f   :  { %478 = vrot.lane.b32.xlu2 %v67_v1, %s845_s8 }
 0x117   :  { %638 = vrot.lane.b32.xlu2 %v735_v3, %s847_s10 }
 0x11a   :  { %438 = vrot.lane.b32.xlu0 %v734_v52, %s846_s9 }
 0x11f   :  { %651 = vrot.lane.b32.xlu2 %v645_v4, %s847_s10 }
 0x127   :  { %v170_v21 = vpop.trf.xlu2 }
 0x128   :  { %702 = vmatmul.msk.f32.vlgmr.msra.gmra.mxu1 %vm120_vm4, %v170_v21 }
 0x12f   :  { %v171_v22 = vpop.trf.xlu2 }
 0x130   :  { %703 = vmatmul.msk.f32.gmra.mxu1 %vm120_vm4, %v171_v22 }
 0x137   :  { %v104_v23 = vpop.trf.xlu2 }
 0x138   :  { %699 = vmatmul.msk.f32.vlgmr.msra.gmra.mxu0 %vm120_vm4, %v104_v23  ;;  %v371_v37 = vpop.trf.xlu0 }
 0x13a   :  { %v303_v41 = vpop.trf.xlu1 }
 0x13b   :  { %707 = vmatmul.msk.f32.vlgmr.msra.gmra.mxu3 %vm322_vm8, %v303_v41 }
 0x13f   :  { %v105_v24 = vpop.trf.xlu2 }
 0x140   :  { %700 = vmatmul.msk.f32.gmra.mxu0 %vm120_vm4, %v105_v24  ;;  %v372_v46 = vpop.trf.xlu0 }
 0x142   :  { %v304_v51 = vpop.trf.xlu1 }
 0x143   :  { %708 = vmatmul.msk.f32.gmra.mxu3 %vm322_vm8, %v304_v51 }
 0x148   :  { %v571_v56 = vpop.trf.xlu0 }
 0x14b   :  { %718 = vmatmul.msk.f32.vlgmr.msrb.gmra.mxu3 %vm522_vm9, %v571_v56 }
 0x150   :  { %v572_v1 = vpop.trf.xlu0 }
 0x153   :  { %719 = vmatmul.msk.f32.gmra.mxu3 %vm522_vm9, %v572_v1 }
 0x169   :  { %v479_v28 = vpop.permute.xlu2 %478 }
 0x16a   :  { %v484_v29 = vsel %vm329_vm3, %v284_v17, %v479_v28 }
 0x16b   :  { %487 = vxpose.xlu1.b32.start.end [1/1] (short) (narrow) %v484_v29, 16 }
 0x1a5   :  { %v209_v30 = vpop.f32.mrf.mxu1 }
 0x1a6   :  { %v226_v31 = vsel %vm215_vm5, %v209_v30, -inf  ;;  %v439_v30 = vpop.permute.xlu0 %438 }
 0x1ad   :  { %v212_v32 = vpop.f32.mrf.mxu1 }
 0x1ae   :  { %v227_v33 = vsel %vm217_vm7, %v212_v32, -inf }
 0x1af   :  { %v228_v34 = vmax.f32 %v226_v31, %v227_v33 }
 0x1b1   :  { %v229_v35 = vrot.slane %v228_v34, 4 }
 0x1b3   :  { %v230_v36 = vmax.f32 %v228_v34, %v229_v35 }
 0x1b5   :  { %v148_v38 = vpop.f32.mrf.mxu0  ;;  %v231_v39 = vrot.slane %v230_v36, 2 }
 0x1b6   :  { %v216_v42 = vsel %vm215_vm5, %v148_v38, -inf }
 0x1b7   :  { %v232_v40 = vmax.f32 %v230_v36, %v231_v39 }
 0x1b9   :  { %v233_v43 = vrot.slane %v232_v40, 1 }
 0x1bb   :  { %v234_v48 = vmax.f32 %v232_v40, %v233_v43  ;;  %v639_v40 = vpop.permute.xlu2 %638 }
 0x1bd   :  { %v151_v44 = vpop.f32.mrf.mxu0  ;;  %v240_v55 = vadd.f32 %v733_v50, %v234_v48 }
 0x1be   :  { %v218_v45 = vsel %vm217_vm7, %v151_v44, -inf  ;;  %v349_v7 = vpop.f32.mrf.mxu3 }
 0x1bf   :  { %v219_v47 = vmax.f32 %v216_v42, %v218_v45  ;;  %v242_v59 = vmax.f32 %v240_v55, 0.0  ;;  %v416_v9 = vsel %vm215_vm5, %v349_v7, -inf }
 0x1c1   :  { %v220_v49 = vrot.slane %v219_v47, 4  ;;  %v246_v63 = vrot.slane %v242_v59, 7 }
 0x1c3   :  { %v221_v53 = vmax.f32 %v219_v47, %v220_v49  ;;  %v652_v44 = vpop.permute.xlu2 %651 }
 0x1c5   :  { %v222_v54 = vrot.slane %v221_v53, 2 }
 0x1c6   :  { %v352_v8 = vpop.f32.mrf.mxu3 }
 0x1c7   :  { %v223_v57 = vmax.f32 %v221_v53, %v222_v54  ;;  %v418_v10 = vsel %vm417_vm11, %v352_v8, -inf }
 0x1c8   :  { %v419_v12 = vmax.f32 %v416_v9, %v418_v10 }
 0x1c9   :  { %v224_v58 = vrot.slane %v223_v57, 1 }
 0x1ca   :  { %v420_v14 = vrot.slane %v419_v12, 4 }
 0x1cb   :  { %v225_v61 = vmax.f32 %v223_v57, %v224_v58 }
 0x1cc   :  { %v421_v16 = vmax.f32 %v419_v12, %v420_v14 }
 0x1cd   :  { %v239_v62 = vadd.f32 %v733_v50, %v225_v61  ;;  %451 = vrot.lane.b32.xlu1 %v445_v60, %s846_s9 }
 0x1ce   :  { %v422_v17 = vrot.slane %v421_v16, 2  ;;  %v610_v33 = vpop.f32.mrf.mxu3 }
 0x1cf   :  { %v241_v0 = vmax.f32 %v239_v62, 0.0  ;;  %v626_v41 = vsel %vm215_vm5, %v610_v33, -inf }
 0x1d0   :  { %v423_v22 = vmax.f32 %v421_v16, %v422_v17 }
 0x1d1   :  { %v248_v2 = vsel %vm247_vm10, %v246_v63, %v241_v0 }
 0x1d2   :  { %705 = vmatmul.msk.f32.vlgmr.msra.gmra.mxu2 %vm215_vm5, %v248_v2  ;;  %v424_v25 = vrot.slane %v423_v22, 1 }
 0x1d4   :  { %v425_v27 = vmax.f32 %v423_v22, %v424_v25 }
 0x1d6   :  { %v441_v32 = vadd.f32 %v439_v30, %v425_v27  ;;  %v613_v39 = vpop.f32.mrf.mxu3 }
 0x1d7   :  { %v627_v42 = vsel %vm617_vm12, %v613_v39, -inf }
 0x1d8   :  { %v443_v35 = vmax.f32 %v441_v32, 0.0  ;;  %v628_v43 = vmax.f32 %v626_v41, %v627_v42 }
 0x1da   :  { %710 = vmatmul.msk.f32.vlgmr.msrb.gmra.mxu2 %vm322_vm8, %v371_v37  ;;  %v629_v45 = vrot.slane %v628_v43, 4 }
 0x1e2   :  { %711 = vmatmul.msk.f32.gmra.mxu2 %vm322_vm8, %v372_v46  ;;  %v630_v46 = vmax.f32 %v628_v43, %v629_v45 }
 0x1e4   :  { %v631_v48 = vrot.slane %v630_v46, 2 }
 0x1e6   :  { %v632_v49 = vmax.f32 %v630_v46, %v631_v48 }
 0x1e8   :  { %v633_v53 = vrot.slane %v632_v49, 1 }
 0x1ea   :  { %v634_v56 = vmax.f32 %v632_v49, %v633_v53 }
 0x1ec   :  { %v642_v59 = vadd.f32 %v639_v40, %v634_v56 }
 0x1ee   :  { %v644_v62 = vmax.f32 %v642_v59, 0.0 }
 0x1f0   :  { %v648_v1 = vrot.slane %v644_v62, 7 }
 0x20f   :  { %v503_v5 = vpop.trf.xlu1 }
 0x210   :  { %715 = vmatmul.msk.f32.vlgmr.msrb.gmra.mxu1 %vm522_vm9, %v503_v5  ;;  %v736_v5 = vld [vmem:[%s949_s4] ss:$0 sm:$0xff] }
 0x217   :  { %v504_v6 = vpop.trf.xlu1 }
 0x218   :  { %716 = vmatmul.msk.f32.gmra.mxu1 %vm522_vm9, %v504_v6 }
 0x23f   :  { %v452_v13 = vpop.permute.xlu1 %451 }
 0x240   :  { %712 = vmatpush.xpose.msk.msrb.mxu0 %vm215_vm5, %v452_v13 }
 0x244   :  { %720 = vmatpush.xpose.msk.msra.mxu0 %vm215_vm5, %v652_v44 }
 0x255   :  { %v927_v11 = vpop.f32.mrf.mxu2 }
 0x256   :  { %v277_v6 = vadd.f32 %v736_v5, %v927_v11 }
 0x25d   :  { %v410_v15 = vpop.f32.mrf.mxu2 }
 0x25e   :  { %v426_v18 = vsel %vm215_vm5, %v410_v15, -inf }
 0x265   :  { %v413_v19 = vpop.f32.mrf.mxu2 }
 0x266   :  { %v427_v20 = vsel %vm417_vm11, %v413_v19, -inf }
 0x267   :  { %v428_v21 = vmax.f32 %v426_v18, %v427_v20 }
 0x269   :  { %v429_v23 = vrot.slane %v428_v21, 4 }
 0x26b   :  { %v430_v24 = vmax.f32 %v428_v21, %v429_v23 }
 0x26d   :  { %v431_v26 = vrot.slane %v430_v24, 2 }
 0x26f   :  { %v432_v28 = vmax.f32 %v430_v24, %v431_v26 }
 0x271   :  { %v433_v29 = vrot.slane %v432_v28, 1 }
 0x273   :  { %v434_v31 = vmax.f32 %v432_v28, %v433_v29 }
 0x275   :  { %v442_v34 = vadd.f32 %v439_v30, %v434_v31 }
 0x277   :  { %v444_v36 = vmax.f32 %v442_v34, 0.0 }
 0x279   :  { %v448_v37 = vrot.slane %v444_v36, 7 }
 0x27b   :  { %v449_v38 = vsel %vm247_vm10, %v448_v37, %v443_v35 }
 0x27c   :  { %713 = vmatmul.msk.f32.vlgmr.msrb.gmra.mxu0 %vm215_vm5, %v449_v38 }
 0x28d   :  { %v549_v47 = vpop.f32.mrf.mxu1 }
 0x28e   :  { %v616_v51 = vsel %vm215_vm5, %v549_v47, -inf }
 0x295   :  { %v552_v50 = vpop.f32.mrf.mxu1 }
 0x296   :  { %v618_v52 = vsel %vm617_vm12, %v552_v50, -inf }
 0x297   :  { %v619_v54 = vmax.f32 %v616_v51, %v618_v52 }
 0x299   :  { %v620_v55 = vrot.slane %v619_v54, 4 }
 0x29b   :  { %v621_v57 = vmax.f32 %v619_v54, %v620_v55 }
 0x29d   :  { %v622_v58 = vrot.slane %v621_v57, 2 }
 0x29f   :  { %v623_v60 = vmax.f32 %v621_v57, %v622_v58 }
 0x2a1   :  { %v624_v61 = vrot.slane %v623_v60, 1 }
 0x2a3   :  { %v625_v63 = vmax.f32 %v623_v60, %v624_v61 }
 0x2a5   :  { %v641_v0 = vadd.f32 %v639_v40, %v625_v63 }
 0x2a7   :  { %v643_v2 = vmax.f32 %v641_v0, 0.0 }
 0x2a9   :  { %v649_v3 = vsel %vm247_vm10, %v648_v1, %v643_v2 }
 0x2aa   :  { %721 = vmatmul.msk.f32.vlgmr.msra.gmra.mxu0 %vm215_vm5, %v649_v3 }
 0x2f9   :  { %v474_v4 = vpop.f32.mrf.mxu0 }
 0x2fa   :  { %v477_v7 = vadd.f32 %v474_v4, %v277_v6 }
 0x327   :  { %v674_v8 = vpop.f32.mrf.mxu0 }
 0x328   :  { %v677_v9 = vadd.f32 %v674_v8, %v477_v7 }
 0x32a   :  { %679 = vst.msk [vmem:[#allocation8] sm:$0x3] %vm678_vm13, %v677_v9 }
 0x32b   :  { %690 = dma.vmem_to_hbm [thread:$0]  %s686_s19, 32, %s688_s22, [#allocation4]  }
 0x32c   :  { %837 = dma.done.wait [#allocation4], 32  }
 0x32d   :  { %838 = vsyncadd [#allocation4], 4294967264 }
 0x32e   :  { %695 = vsyncpa [#allocation3], 1 }
 0x32f   :  { %696 = vsyncpa [#allocation6], 1 }
 0x330   :  { %697 = vsyncpa [#allocation4], 1 }

</bundles_post_ra>
